<compile_context>
chip_gen: v7x
topology: tpu7x:2x2x1
jax: 0.10.0
libtpu: 0.0.40
codegen_flags: <defaults>
</compile_context>

<pallas_src>
import math

import jax
import jax.numpy as jnp
from jax.experimental import pallas as pl
from jax.experimental.pallas import tpu as pltpu

_LANE = 128
_SUBLANE_BF16 = 16  # bf16 packs 16 rows per vreg sublane group


def _round_up(x, m):
    return ((x + m - 1) // m) * m


def _num_tensorcores_per_chip():
    """2 TensorCores per chip on v7x (and megacore v4/v5p); 1 on v5e/v6e."""
    try:
        kind = jax.devices()[0].device_kind.lower().replace(" ", "")
    except Exception:
        return 1
    if ("v7" in kind) or ("v4" in kind) or ("v5p" in kind):
        return 2
    return 1


def _pick_block_b(B, D, H, n_pad, out_itemsize):
    """Batch tile choice (per perf review):
      * single-TC chips: grid is a sequential loop -> one full-batch tile
        avoids the ~0.35us per-grid-step overhead entirely;
      * dual-TC chips: exactly two balanced 'parallel' tiles -> one per core,
        no extra sequential steps.
    Cap comes from VMEM arithmetic, not a hard-coded constant."""
    if B <= _SUBLANE_BF16:
        return B  # one tiny tile (block == full dim is always legal)

    # Resident weights/biases (pipeline double-buffers them; their index map is
    # constant so they are only DMA'd once — footprint only, no extra traffic).
    weight_bytes = 2 * ((D * H + H * H + H * n_pad) * 2 + (2 * H + n_pad) * 4)
    # Double-buffered streaming: z rows in (bf16) + output rows out.
    per_row = 2 * (D * 2 + n_pad * out_itemsize)
    budget = 12 * 1024 * 1024  # conservative: fits v5e's 16 MiB default scoped VMEM
    max_blk = max(_SUBLANE_BF16,
                  ((budget - weight_bytes) // per_row) // _SUBLANE_BF16 * _SUBLANE_BF16)

    if _num_tensorcores_per_chip() >= 2:
        target = _round_up(pl.cdiv(B, 2), _SUBLANE_BF16)  # 2 balanced tiles
    else:
        target = B                                         # 1 grid step
    return min(target, max_blk)


def _gen_kernel(z_ref, w1_ref, b1_ref, w2_ref, b2_ref, w3_ref, b3_ref, o_ref):
    # Layer 1: Linear(input_dim -> hidden) + ReLU.  bf16 MXU, f32 accumulate.
    h1 = jnp.dot(z_ref[...], w1_ref[...], preferred_element_type=jnp.float32)
    h1 = jnp.maximum(h1 + b1_ref[...], 0.0)
    # Layer 2: Linear(hidden -> hidden) + ReLU
    h2 = jnp.dot(h1.astype(jnp.bfloat16), w2_ref[...],
                 preferred_element_type=jnp.float32)
    h2 = jnp.maximum(h2 + b2_ref[...], 0.0)
    # Layer 3: Linear(hidden -> n_pad) + Sigmoid (output lane-padded to 128),
    # stored in the (typically bf16) output dtype -> lane-dense, half the bytes.
    logit = jnp.dot(h2.astype(jnp.bfloat16), w3_ref[...],
                    preferred_element_type=jnp.float32)
    o_ref[...] = jax.nn.sigmoid(logit + b3_ref[...]).astype(o_ref.dtype)


def prepare_generator_params(params):
    """One-time preprocessing, hoisted out of the per-call hot path:
    bf16 weights, f32 biases, w3/b3 zero-padded to a multiple of 128 lanes."""
    out_dim = params["w3"].shape[1]
    n_pad = _round_up(out_dim, _LANE)
    w3 = params["w3"].astype(jnp.bfloat16)
    b3 = params["b3"].astype(jnp.float32).reshape(1, -1)
    if n_pad != out_dim:
        w3 = jnp.pad(w3, ((0, 0), (0, n_pad - out_dim)))
        b3 = jnp.pad(b3, ((0, 0), (0, n_pad - out_dim)))
    prep = {
        "w1": params["w1"].astype(jnp.bfloat16),
        "b1": params["b1"].astype(jnp.float32).reshape(1, -1),
        "w2": params["w2"].astype(jnp.bfloat16),
        "b2": params["b2"].astype(jnp.float32).reshape(1, -1),
        "w3": w3,
        "b3": b3,
        "out_dim": out_dim,  # static python int
    }
    return prep


def generator_forward(z, prep, *, block_b=None, out_dtype=jnp.bfloat16,
                      return_padded=False):
    """z: (B, input_dim), ideally already bf16.  prep: prepare_generator_params()."""
    B, D = z.shape
    H = prep["w1"].shape[1]
    n_pad = prep["w3"].shape[1]
    out_dim = prep["out_dim"]

    zb = z.astype(jnp.bfloat16)  # no-op if caller already supplies bf16

    if block_b is None:
        block_b = _pick_block_b(B, D, H, n_pad, jnp.dtype(out_dtype).itemsize)
    grid = (pl.cdiv(B, block_b),)

    # NOTE: the weight/bias specs have constant index maps, so the pipeline
    # fetches them once at step 0 and never re-DMAs.  At H=128 their
    # double-buffer footprint (~80 KiB) is negligible; if hidden_dim is scaled
    # up, single-buffer them (pipeline_mode=pl.Buffered(1)) to halve that.
    out_padded = pl.pallas_call(
        _gen_kernel,
        out_shape=jax.ShapeDtypeStruct((B, n_pad), out_dtype),
        grid_spec=pltpu.PrefetchScalarGridSpec(
            num_scalar_prefetch=0,
            grid=grid,
            in_specs=[
                pl.BlockSpec((block_b, D), lambda i: (i, 0)),   # z tile (streamed)
                pl.BlockSpec((D, H), lambda i: (0, 0)),         # w1 (resident)
                pl.BlockSpec((1, H), lambda i: (0, 0)),         # b1
                pl.BlockSpec((H, H), lambda i: (0, 0)),         # w2
                pl.BlockSpec((1, H), lambda i: (0, 0)),         # b2
                pl.BlockSpec((H, n_pad), lambda i: (0, 0)),     # w3 (lane-padded)
                pl.BlockSpec((1, n_pad), lambda i: (0, 0)),     # b3
            ],
            out_specs=pl.BlockSpec((block_b, n_pad), lambda i: (i, 0)),
        ),
        compiler_params=pltpu.CompilerParams(
            dimension_semantics=("parallel",),
        ),
    )(zb, prep["w1"], prep["b1"], prep["w2"], prep["b2"], prep["w3"], prep["b3"])

    if return_padded or n_pad == out_dim:
        # Padded lanes hold sigmoid(0)=0.5 — consumer must ignore cols >= out_dim.
        return out_padded
    return out_padded[:, :out_dim]


def init_generator_params(key, input_dim, output_dim, hidden_dim=128):
    """Deterministic init mirroring PyTorch nn.Linear default:
    U(-1/sqrt(fan_in), 1/sqrt(fan_in)) for weight and bias; weights stored (in, out)."""
    ks = jax.random.split(key, 6)

    def linear(kw, kb, fan_in, fan_out):
        bound = 1.0 / math.sqrt(fan_in)
        w = jax.random.uniform(kw, (fan_in, fan_out), jnp.float32, -bound, bound)
        b = jax.random.uniform(kb, (1, fan_out), jnp.float32, -bound, bound)
        return w, b

    w1, b1 = linear(ks[0], ks[1], input_dim, hidden_dim)
    w2, b2 = linear(ks[2], ks[3], hidden_dim, hidden_dim)
    w3, b3 = linear(ks[4], ks[5], hidden_dim, output_dim)
    return {"w1": w1, "b1": b1, "w2": w2, "b2": b2, "w3": w3, "b3": b3}


def _reference_forward(z, p):
    # Mirrors the kernel's numerics: bf16 matmul operands, f32 accumulate,
    # f32 bias/ReLU/Sigmoid (output kept in f32 for comparison).
    h = jnp.dot(z.astype(jnp.bfloat16), p["w1"].astype(jnp.bfloat16),
                preferred_element_type=jnp.float32)
    h = jnp.maximum(h + p["b1"], 0.0)
    h = jnp.dot(h.astype(jnp.bfloat16), p["w2"].astype(jnp.bfloat16),
                preferred_element_type=jnp.float32)
    h = jnp.maximum(h + p["b2"], 0.0)
    logit = jnp.dot(h.astype(jnp.bfloat16), p["w3"].astype(jnp.bfloat16),
                    preferred_element_type=jnp.float32) + p["b3"]
    return jax.nn.sigmoid(logit)


if __name__ == "__main__":
    key = jax.random.PRNGKey(0)
    k_z, k_p = jax.random.split(key)

    batch = 64          # 1 grid step on v5e/v6e; 2 balanced parallel tiles on v7x
    input_dim = 64      # latent dim
    hidden_dim = 128    # module default (MXU/lane friendly)
    output_dim = 32     # lane-padded to 128 inside the kernel, sliced back here

    z = jax.random.normal(k_z, (batch, input_dim), dtype=jnp.float32)
    z = z.astype(jnp.bfloat16)  # supply z in bf16 (matmul operand dtype)

    params = init_generator_params(k_p, input_dim, output_dim, hidden_dim)
    prep = prepare_generator_params(params)      # one-time bf16 cast + lane pad
    prep = jax.block_until_ready(prep)

    out = generator_forward(z, prep)
    out = jax.block_until_ready(out)

    ref = _reference_forward(z, params)
    assert out.shape == (batch, output_dim)
    assert out.dtype == jnp.bfloat16
    assert jnp.allclose(out.astype(jnp.float32), ref, atol=1e-2, rtol=1e-2), \
        "mismatch vs reference"

    print("KERNEL_OK")
</pallas_src>

<mosaic_0001>
module attributes {stable_mosaic.version = 11 : i64} {
  func.func @_gen_kernel(%arg0: i32, %arg1: memref<64x64xbf16, #tpu.memory_space<vmem>>, %arg2: memref<64x128xbf16, #tpu.memory_space<vmem>>, %arg3: memref<1x128xf32, #tpu.memory_space<vmem>>, %arg4: memref<128x128xbf16, #tpu.memory_space<vmem>>, %arg5: memref<1x128xf32, #tpu.memory_space<vmem>>, %arg6: memref<128x128xbf16, #tpu.memory_space<vmem>>, %arg7: memref<1x128xf32, #tpu.memory_space<vmem>>, %arg8: memref<64x128xbf16, #tpu.memory_space<vmem>>) attributes {dimension_semantics = [#tpu.dimension_semantics<parallel>], iteration_bounds = array<i64: 1>, scalar_prefetch = 0 : i64, scratch_operands = 0 : i64, tpu.core_type = #tpu.core_type<tc>, window_params = [{transform_indices = @transform_0, window_bounds = array<i64: 64, 64>}, {pipeline_mode = #tpu.pipeline_mode<synchronous>, transform_indices = @transform_1, window_bounds = array<i64: 64, 128>}, {pipeline_mode = #tpu.pipeline_mode<synchronous>, transform_indices = @transform_2, window_bounds = array<i64: 1, 128>}, {pipeline_mode = #tpu.pipeline_mode<synchronous>, transform_indices = @transform_3, window_bounds = array<i64: 128, 128>}, {pipeline_mode = #tpu.pipeline_mode<synchronous>, transform_indices = @transform_4, window_bounds = array<i64: 1, 128>}, {pipeline_mode = #tpu.pipeline_mode<synchronous>, transform_indices = @transform_5, window_bounds = array<i64: 128, 128>}, {pipeline_mode = #tpu.pipeline_mode<synchronous>, transform_indices = @transform_6, window_bounds = array<i64: 1, 128>}, {transform_indices = @transform_7, window_bounds = array<i64: 64, 128>}]} {
    %c0 = arith.constant 0 : index
    %c0_0 = arith.constant 0 : index
    %0 = vector.load %arg1[%c0, %c0_0] : memref<64x64xbf16, #tpu.memory_space<vmem>>, vector<64x64xbf16>
    %c0_1 = arith.constant 0 : index
    %c0_2 = arith.constant 0 : index
    %1 = vector.load %arg2[%c0_1, %c0_2] : memref<64x128xbf16, #tpu.memory_space<vmem>>, vector<64x128xbf16>
    %cst = arith.constant dense<0.000000e+00> : vector<64x128xf32>
    %2 = tpu.matmul %0, %1, %cst {dimension_numbers = #tpu.dot_dimension_numbers<[1], [0], [0], [1], [0, 0, 1, 1], [], []>} : vector<64x64xbf16>, vector<64x128xbf16>, vector<64x128xf32> -> vector<64x128xf32>
    %c0_3 = arith.constant 0 : index
    %c0_4 = arith.constant 0 : index
    %3 = vector.load %arg3[%c0_3, %c0_4] : memref<1x128xf32, #tpu.memory_space<vmem>>, vector<1x128xf32>
    %4 = vector.broadcast %3 : vector<1x128xf32> to vector<64x128xf32>
    %5 = arith.addf %2, %4 : vector<64x128xf32>
    %cst_5 = arith.constant 0.000000e+00 : f32
    %6 = vector.broadcast %cst_5 : f32 to vector<64x128xf32>
    %7 = arith.maximumf %5, %6 : vector<64x128xf32>
    %8 = arith.truncf %7 : vector<64x128xf32> to vector<64x128xbf16>
    %c0_6 = arith.constant 0 : index
    %c0_7 = arith.constant 0 : index
    %9 = vector.load %arg4[%c0_6, %c0_7] : memref<128x128xbf16, #tpu.memory_space<vmem>>, vector<128x128xbf16>
    %cst_8 = arith.constant dense<0.000000e+00> : vector<64x128xf32>
    %10 = tpu.matmul %8, %9, %cst_8 {dimension_numbers = #tpu.dot_dimension_numbers<[1], [0], [0], [1], [0, 0, 1, 1], [], []>} : vector<64x128xbf16>, vector<128x128xbf16>, vector<64x128xf32> -> vector<64x128xf32>
    %c0_9 = arith.constant 0 : index
    %c0_10 = arith.constant 0 : index
    %11 = vector.load %arg5[%c0_9, %c0_10] : memref<1x128xf32, #tpu.memory_space<vmem>>, vector<1x128xf32>
    %12 = vector.broadcast %11 : vector<1x128xf32> to vector<64x128xf32>
    %13 = arith.addf %10, %12 : vector<64x128xf32>
    %cst_11 = arith.constant 0.000000e+00 : f32
    %14 = vector.broadcast %cst_11 : f32 to vector<64x128xf32>
    %15 = arith.maximumf %13, %14 : vector<64x128xf32>
    %16 = arith.truncf %15 : vector<64x128xf32> to vector<64x128xbf16>
    %c0_12 = arith.constant 0 : index
    %c0_13 = arith.constant 0 : index
    %17 = vector.load %arg6[%c0_12, %c0_13] : memref<128x128xbf16, #tpu.memory_space<vmem>>, vector<128x128xbf16>
    %cst_14 = arith.constant dense<0.000000e+00> : vector<64x128xf32>
    %18 = tpu.matmul %16, %17, %cst_14 {dimension_numbers = #tpu.dot_dimension_numbers<[1], [0], [0], [1], [0, 0, 1, 1], [], []>} : vector<64x128xbf16>, vector<128x128xbf16>, vector<64x128xf32> -> vector<64x128xf32>
    %c0_15 = arith.constant 0 : index
    %c0_16 = arith.constant 0 : index
    %19 = vector.load %arg7[%c0_15, %c0_16] : memref<1x128xf32, #tpu.memory_space<vmem>>, vector<1x128xf32>
    %20 = vector.broadcast %19 : vector<1x128xf32> to vector<64x128xf32>
    %21 = arith.addf %18, %20 : vector<64x128xf32>
    %22 = arith.negf %21 : vector<64x128xf32>
    %23 = math.exp %22 : vector<64x128xf32>
    %cst_17 = arith.constant 1.000000e+00 : f32
    %24 = vector.broadcast %cst_17 : f32 to vector<64x128xf32>
    %25 = arith.addf %24, %23 : vector<64x128xf32>
    %26 = arith.divf %24, %25 : vector<64x128xf32>
    %27 = arith.truncf %26 : vector<64x128xf32> to vector<64x128xbf16>
    %c0_18 = arith.constant 0 : index
    %c0_19 = arith.constant 0 : index
    %28 = vector.load %arg8[%c0_18, %c0_19] : memref<64x128xbf16, #tpu.memory_space<vmem>>, vector<64x128xbf16>
    tpu.vector_store %arg8[%c0_18, %c0_19], %27 {strides = array<i32>} : memref<64x128xbf16, #tpu.memory_space<vmem>>, vector<64x128xbf16>,
    return
  }
  func.func @transform_0(%arg0: i32) -> (i32, i32) {
    %c0_i32 = arith.constant 0 : i32
    %c0_i32_0 = arith.constant 0 : i32
    return %arg0, %c0_i32 : i32, i32
  }
  func.func @transform_1(%arg0: i32) -> (i32, i32) {
    %c0_i32 = arith.constant 0 : i32
    %c0_i32_0 = arith.constant 0 : i32
    %c0_i32_1 = arith.constant 0 : i32
    return %c0_i32, %c0_i32_0 : i32, i32
  }
  func.func @transform_2(%arg0: i32) -> (i32, i32) {
    %c0_i32 = arith.constant 0 : i32
    %c0_i32_0 = arith.constant 0 : i32
    %c0_i32_1 = arith.constant 0 : i32
    return %c0_i32, %c0_i32_0 : i32, i32
  }
  func.func @transform_3(%arg0: i32) -> (i32, i32) {
    %c0_i32 = arith.constant 0 : i32
    %c0_i32_0 = arith.constant 0 : i32
    %c0_i32_1 = arith.constant 0 : i32
    return %c0_i32, %c0_i32_0 : i32, i32
  }
  func.func @transform_4(%arg0: i32) -> (i32, i32) {
    %c0_i32 = arith.constant 0 : i32
    %c0_i32_0 = arith.constant 0 : i32
    %c0_i32_1 = arith.constant 0 : i32
    return %c0_i32, %c0_i32_0 : i32, i32
  }
  func.func @transform_5(%arg0: i32) -> (i32, i32) {
    %c0_i32 = arith.constant 0 : i32
    %c0_i32_0 = arith.constant 0 : i32
    %c0_i32_1 = arith.constant 0 : i32
    return %c0_i32, %c0_i32_0 : i32, i32
  }
  func.func @transform_6(%arg0: i32) -> (i32, i32) {
    %c0_i32 = arith.constant 0 : i32
    %c0_i32_0 = arith.constant 0 : i32
    %c0_i32_1 = arith.constant 0 : i32
    return %c0_i32, %c0_i32_0 : i32, i32
  }
  func.func @transform_7(%arg0: i32) -> (i32, i32) {
    %c0_i32 = arith.constant 0 : i32
    %c0_i32_0 = arith.constant 0 : i32
    return %arg0, %c0_i32 : i32, i32
  }
}

</mosaic_0001>

<bundles_post_ra>
// kernel: tpu_custom_call.1
= control target key start
LH: loop header
LB: loop body
LE: loop exit
PB: predicated region body
PF: predicated region fallthrough
CT: control target
= control target key end

     0   :  { %12 = vsyncpa [#allocation3], 0  ;;  %s1135_s0 = inlined_call_operand.hbm [shape: bf16[64,64], index: 0, kind: input, shape index: {}]   ;;  %s1136_s1 = inlined_call_operand.hbm [shape: bf16[64,128], index: 1, kind: input, shape index: {}]   ;;  %s1137_s2 = inlined_call_operand.vmem [shape: f32[1,128], index: 2, kind: input, shape index: {}]   ;;  %s1138_s3 = inlined_call_operand.hbm [shape: bf16[128,128], index: 3, kind: input, shape index: {}]   ;;  %s1139_s4 = inlined_call_operand.vmem [shape: f32[1,128], index: 4, kind: input, shape index: {}]   ;;  %s1140_s5 = inlined_call_operand.hbm [shape: bf16[128,128], index: 5, kind: input, shape index: {}]   ;;  %s1141_s6 = inlined_call_operand.vmem [shape: f32[1,128], index: 6, kind: input, shape index: {}]   ;;  %s1142_s7 = inlined_call_operand.hbm [shape: bf16[64,128], index: 7, kind: output, shape index: {}]  }
   0x1   :  { %13 = vsyncpa [#allocation6], 0 }
   0x2   :  { %14 = vsyncpa [#allocation9], 0 }
   0x3   :  { %15 = vsyncpa [#allocation4], 0  ;;  %s986_s24 = smov [#allocation5]   ;;  %s987_s26 = smov [#allocation2]  }
   0x4   :  { %s33_s25 = sshll.u32 %s986_s24, 4  ;;  %s21_s27 = sshll.u32 %s987_s26, 4  ;;  %s34_s25 = int_to_ptr.vmem [resolvable:$true] %s33_s25  ;;  %s1033_s27 = int_to_ptr.vmem [resolvable:$true] %s21_s27 }
   0x5   :  { %s868_s30 = scalar_lea.hbm %s1136_s1, 512 }
   0x6   :  { %p869_p0 = scmp.ne.s32.totalorder %s1136_s1, %s868_s30  ;;  %p872_p1 = scmp.lt.u32.totalorder %s868_s30, %s1136_s1 }
   0x8   :  { %p874_p2 = pnand %p872_p1, %p869_p0 }
   0xa   :  { %877 = shalt.err (!%p874_p2)
}
   0xb   :  { %s878_s12 = scalar_lea.vmem %s34_s25, 512  ;;  %p883_p4 = scmp.lt.s32.totalorder %s34_s25, %s34_s25 }
   0xc   :  { %p879_p3 = scmp.ne.s32.totalorder %s34_s25, %s878_s12  ;;  %p884_p5 = scmp.lt.s32.totalorder %s878_s12, %s878_s12 }
   0xe   :  { %p885_p6 = por %p884_p5, %p883_p4 }
  0x10   :  { %p886_p7 = pnand %p885_p6, %p879_p3 }
  0x12   :  { %889 = shalt.err (!%p886_p7)
}
  0x13   :  { %s988_s13 = smov 64   ;;  %s989_s14 = smov 4  }
  0x14   :  { %39 = dma.hbm_to_vmem [thread:$0]  %s1136_s1, 512, %s34_s25, [#allocation6], %s988_s13, %s988_s13, %s989_s14  }
  0x15   :  { %s890_s19 = scalar_lea.hbm %s1135_s0, 512 }
  0x16   :  { %p891_p8 = scmp.ne.s32.totalorder %s1135_s0, %s890_s19  ;;  %p894_p9 = scmp.lt.u32.totalorder %s890_s19, %s1135_s0 }
  0x18   :  { %p896_p10 = pnand %p894_p9, %p891_p8 }
  0x1a   :  { %899 = shalt.err (!%p896_p10)
}
  0x1b   :  { %s900_s24 = scalar_lea.vmem %s1033_s27, 512  ;;  %p905_p12 = scmp.lt.s32.totalorder %s1033_s27, %s1033_s27 }
  0x1c   :  { %p901_p11 = scmp.ne.s32.totalorder %s1033_s27, %s900_s24  ;;  %p906_p13 = scmp.lt.s32.totalorder %s900_s24, %s900_s24 }
  0x1e   :  { %p907_p0 = por %p906_p13, %p905_p12 }
  0x20   :  { %p908_p1 = pnand %p907_p0, %p901_p11 }
  0x22   :  { %911 = shalt.err (!%p908_p1)
}
  0x23   :  { %27 = dma.hbm_to_vmem [thread:$0]  %s1135_s0, 512, %s1033_s27, [#allocation3], %s988_s13, %s988_s13, %s989_s14  }
  0x24   :  { %s990_s26 = smov [#allocation7]   ;;  %s991_s29 = smov [#allocation8]  }
  0x25   :  { %s47_s28 = sshll.u32 %s990_s26, 4  ;;  %s61_s30 = sshll.u32 %s991_s29, 4  ;;  %s48_s28 = int_to_ptr.vmem [resolvable:$true] %s47_s28  ;;  %s1070_s30 = int_to_ptr.vmem [resolvable:$true] %s61_s30 }
  0x26   :  { %s912_s10 = scalar_lea.hbm %s1138_s3, 1024 }
  0x27   :  { %p913_p2 = scmp.ne.s32.totalorder %s1138_s3, %s912_s10  ;;  %p916_p3 = scmp.lt.u32.totalorder %s912_s10, %s1138_s3 }
  0x29   :  { %p918_p4 = pnand %p916_p3, %p913_p2 }
  0x2b   :  { %921 = shalt.err (!%p918_p4)
}
  0x2c   :  { %s922_s0 = scalar_lea.vmem %s48_s28, 1024  ;;  %p927_p6 = scmp.lt.s32.totalorder %s48_s28, %s48_s28 }
  0x2d   :  { %p923_p5 = scmp.ne.s32.totalorder %s48_s28, %s922_s0  ;;  %p928_p7 = scmp.lt.s32.totalorder %s922_s0, %s922_s0 }
  0x2f   :  { %p929_p8 = por %p928_p7, %p927_p6 }
  0x31   :  { %p930_p9 = pnand %p929_p8, %p923_p5 }
  0x33   :  { %933 = shalt.err (!%p930_p9)
}
  0x34   :  { %53 = dma.hbm_to_vmem [thread:$0]  %s1138_s3, 1024, %s48_s28, [#allocation6], %s988_s13, %s988_s13, %s989_s14  }
  0x35   :  { %s934_s20 = scalar_lea.hbm %s1140_s5, 1024 }
  0x36   :  { %p935_p10 = scmp.ne.s32.totalorder %s1140_s5, %s934_s20  ;;  %p938_p11 = scmp.lt.u32.totalorder %s934_s20, %s1140_s5 }
  0x38   :  { %p940_p12 = pnand %p938_p11, %p935_p10 }
  0x3a   :  { %943 = shalt.err (!%p940_p12)
}
  0x3b   :  { %s944_s1 = scalar_lea.vmem %s1070_s30, 1024  ;;  %p949_p0 = scmp.lt.s32.totalorder %s1070_s30, %s1070_s30 }
  0x3c   :  { %p945_p13 = scmp.ne.s32.totalorder %s1070_s30, %s944_s1  ;;  %p950_p1 = scmp.lt.s32.totalorder %s944_s1, %s944_s1 }
  0x3e   :  { %p951_p2 = por %p950_p1, %p949_p0 }
  0x40   :  { %p952_p3 = pnand %p951_p2, %p945_p13 }
  0x42   :  { %955 = shalt.err (!%p952_p3)
}
  0x43   :  { %67 = dma.hbm_to_vmem [thread:$0]  %s1140_s5, 1024, %s1070_s30, [#allocation9], %s988_s13, %s988_s13, %s989_s14  }
  0x44   :  { %978 = dma.done.wait [#allocation3], 512  }
  0x45   :  { %979 = vsyncadd [#allocation3], 4294966784 }
  0x46   :  { %980 = dma.done.wait [#allocation6], 1536  }
  0x47   :  { %981 = vsyncadd [#allocation6], 4294965760 }
  0x48   :  { %982 = dma.done.wait [#allocation9], 1024  }
  0x49   :  { %983 = vsyncadd [#allocation9], 4294966272  ;;  %v812_v0 = vld [vmem:[#allocation5] sm:$0xff]   ;;  %v813_v1 = vld [vmem:[#allocation5 + $0x8] sm:$0xff]   ;;  %vm150_vm0 = vcmask 523264  }
  0x4a   :  { %741 = vmatprep.subr.bf16.mxu0 %v812_v0  ;;  %v814_v2 = vld [vmem:[#allocation5 + $0x10] sm:$0xff]   ;;  %v816_v3 = vld [vmem:[#allocation2] sm:$0xff]   ;;  %v815_v4 = vld [vmem:[#allocation5 + $0x18] sm:$0xff]  }
  0x4b   :  { %742 = vmatpush3.bf16.msra.mxu0 %v812_v0  ;;  %749 = vmatprep.mubr.msk.bf16.mxu0 %vm150_vm0, %v816_v3  ;;  %v820_v5 = vld [vmem:[#allocation7] sm:$0xff]   ;;  %v821_v6 = vld [vmem:[#allocation7 + $0x8] sm:$0xff]   ;;  %v822_v8 = vld [vmem:[#allocation7 + $0x10] sm:$0xff]  }
  0x4c   :  { %743 = vmatprep.subr.bf16.mxu0 %v813_v1  ;;  %757 = vmatprep.subr.bf16.mxu1 %v820_v5  ;;  %v817_v7 = vld [vmem:[#allocation2 + $0x8] sm:$0xff]   ;;  %v818_v9 = vld [vmem:[#allocation2 + $0x10] sm:$0xff]   ;;  %v823_v10 = vld [vmem:[#allocation7 + $0x18] sm:$0xff]  }
  0x4d   :  { %758 = vmatpush3.bf16.msra.mxu1 %v820_v5  ;;  %v824_v11 = vld [vmem:[#allocation7 + $0x20] sm:$0xff]   ;;  %v819_v12 = vld [vmem:[#allocation2 + $0x18] sm:$0xff]   ;;  %v825_v13 = vld [vmem:[#allocation7 + $0x28] sm:$0xff]  }
  0x4e   :  { %759 = vmatprep.subr.bf16.mxu1 %v821_v6  ;;  %v826_v14 = vld [vmem:[#allocation7 + $0x30] sm:$0xff]   ;;  %v827_v15 = vld [vmem:[#allocation7 + $0x38] sm:$0xff]   ;;  %v828_v16 = vld [vmem:[#allocation8] sm:$0xff]  }
  0x4f   :  { %744 = vmatpush3.bf16.msra.mxu0 %v813_v1  ;;  %v829_v17 = vld [vmem:[#allocation8 + $0x8] sm:$0xff]   ;;  %v830_v18 = vld [vmem:[#allocation8 + $0x10] sm:$0xff]   ;;  %v831_v19 = vld [vmem:[#allocation8 + $0x18] sm:$0xff]  }
  0x50   :  { %745 = vmatprep.subr.bf16.mxu0 %v814_v2  ;;  %v832_v20 = vld [vmem:[#allocation8 + $0x20] sm:$0xff]   ;;  %v833_v21 = vld [vmem:[#allocation8 + $0x28] sm:$0xff]   ;;  %v834_v51 = vld [vmem:[#allocation8 + $0x30] sm:$0xff]  }
  0x51   :  { %760 = vmatpush3.bf16.msra.mxu1 %v821_v6  ;;  %v631_v22 = vld [vmem:[%s1137_s2] ss:$0 sm:$0xff]  ;;  %v835_v52 = vld [vmem:[#allocation8 + $0x38] sm:$0xff]  }
  0x52   :  { %761 = vmatprep.subr.bf16.mxu1 %v822_v8  ;;  %v644_v53 = vld [vmem:[%s1139_s4] ss:$0 sm:$0xff] }
  0x53   :  { %746 = vmatpush3.bf16.msra.mxu0 %v814_v2 }
  0x54   :  { %747 = vmatprep.subr.bf16.mxu0 %v815_v4 }
  0x55   :  { %762 = vmatpush3.bf16.msra.mxu1 %v822_v8 }
  0x56   :  { %763 = vmatprep.subr.bf16.mxu1 %v823_v10 }
  0x57   :  { %748 = vmatpush3.bf16.msra.mxu0 %v815_v4 }
  0x58   :  { %781 = vmatprep.subr.bf16.mxu0 %v828_v16 }
  0x59   :  { %764 = vmatpush3.bf16.msra.mxu1 %v823_v10 }
  0x5a   :  { %750 = vmatmul.mubr.msk.bf16.vlgmr.msra.gmra.mrb[0].mxu0 %vm150_vm0, %v817_v7  ;;  %765 = vmatprep.subr.bf16.mxu1 %v824_v11 }
  0x5b   :  { %753 = vmatprep.mubr.msk.bf16.mxu0 %vm150_vm0, %v818_v9  ;;  %782 = vmatpush3.bf16.msra.mxu0 %v828_v16 }
  0x5c   :  { %783 = vmatprep.subr.bf16.mxu0 %v829_v17 }
  0x5d   :  { %766 = vmatpush3.bf16.msra.mxu1 %v824_v11 }
  0x5e   :  { %767 = vmatprep.subr.bf16.mxu1 %v825_v13 }
  0x5f   :  { %784 = vmatpush3.bf16.msra.mxu0 %v829_v17 }
  0x60   :  { %785 = vmatprep.subr.bf16.mxu0 %v830_v18 }
  0x61   :  { %768 = vmatpush3.bf16.msra.mxu1 %v825_v13 }
  0x62   :  { %754 = vmatmul.mubr.msk.bf16.gmra.mrb[4].mxu0 %vm150_vm0, %v819_v12  ;;  %769 = vmatprep.subr.bf16.mxu1 %v826_v14 }
  0x63   :  { %786 = vmatpush3.bf16.msra.mxu0 %v830_v18  ;;  %v653_v18 = vld [vmem:[%s1141_s6] ss:$0 sm:$0xff]  ;;  %s992_s6 = smov [#allocation10]  }
  0x64   :  { %787 = vmatprep.subr.bf16.mxu0 %v831_v19  ;;  %s617_s30 = sshll.u32 %s992_s6, 4  ;;  %s618_s30 = int_to_ptr.vmem [resolvable:$true] %s617_s30 }
  0x65   :  { %770 = vmatpush3.bf16.msra.mxu1 %v826_v14  ;;  %s956_s8 = scalar_lea.vmem %s618_s30, 512  ;;  %p961_p5 = scmp.lt.s32.totalorder %s618_s30, %s618_s30 }
  0x66   :  { %771 = vmatprep.subr.bf16.mxu1 %v827_v15  ;;  %p957_p4 = scmp.ne.s32.totalorder %s618_s30, %s956_s8  ;;  %p962_p6 = scmp.lt.s32.totalorder %s956_s8, %s956_s8 }
  0x67   :  { %788 = vmatpush3.bf16.msra.mxu0 %v831_v19 }
  0x68   :  { %789 = vmatprep.subr.bf16.mxu0 %v832_v20  ;;  %p963_p7 = por %p962_p6, %p961_p5 }
  0x69   :  { %772 = vmatpush3.bf16.msra.mxu1 %v827_v15 }
  0x6a   :  { %p964_p8 = pnand %p963_p7, %p957_p4 }
  0x6b   :  { %790 = vmatpush3.bf16.msra.mxu0 %v832_v20 }
  0x6c   :  { %791 = vmatprep.subr.bf16.mxu0 %v833_v21 }
  0x6f   :  { %792 = vmatpush3.bf16.msra.mxu0 %v833_v21 }
  0x70   :  { %793 = vmatprep.subr.bf16.mxu0 %v834_v51 }
  0x73   :  { %794 = vmatpush3.bf16.msra.mxu0 %v834_v51 }
  0x74   :  { %795 = vmatprep.subr.bf16.mxu0 %v835_v52 }
  0x77   :  { %796 = vmatpush3.bf16.msra.mxu0 %v835_v52 }
 0x12d   :  { %v751_v23 = vpop.f32.mrb[0].mxu0 }
 0x12e   :  { %v206_v24 = vadd.f32 %v751_v23, %v631_v22  ;;  %v197_v25 = vpop.f32.mrb[1].mxu0 }
 0x12f   :  { %v198_v26 = vadd.f32 %v631_v22, %v197_v25  ;;  %v752_v27 = vpop.f32.mrb[2].mxu0 }
 0x130   :  { %v209_v28 = vadd.f32 %v752_v27, %v631_v22  ;;  %v200_v29 = vpop.f32.mrb[3].mxu0  ;;  %v230_v31 = vmax.f32 %v206_v24, 0.0 }
 0x131   :  { %v201_v30 = vadd.f32 %v631_v22, %v200_v29  ;;  %v228_v33 = vmax.f32 %v198_v26, 0.0 }
 0x132   :  { %v231_v32 = vmax.f32 %v209_v28, 0.0 }
 0x133   :  { %v229_v34 = vmax.f32 %v201_v30, 0.0 }
 0x134   :  { %v237_v35 = vpack.c.bf16 %v231_v32, %v230_v31 }
 0x135   :  { %v755_v36 = vpop.f32.mrb[4].mxu0  ;;  %v236_v37 = vpack.c.bf16 %v229_v34, %v228_v33 }
 0x136   :  { %v222_v38 = vadd.f32 %v755_v36, %v631_v22  ;;  %v213_v39 = vpop.f32.mrb[5].mxu0 }
 0x137   :  { %v214_v40 = vadd.f32 %v631_v22, %v213_v39  ;;  %v756_v41 = vpop.f32.mrb[6].mxu0  ;;  %773 = vmatprep.mubr.bf16.mxu1 %v236_v37 }
 0x138   :  { %v225_v42 = vadd.f32 %v756_v41, %v631_v22  ;;  %v216_v43 = vpop.f32.mrb[7].mxu0  ;;  %774 = vmatmul.mubr.bf16.vlgmr.msra.gmra.mrb[0].mxu1 %v237_v35  ;;  %v234_v45 = vmax.f32 %v222_v38, 0.0 }
 0x139   :  { %v217_v44 = vadd.f32 %v631_v22, %v216_v43  ;;  %v232_v47 = vmax.f32 %v214_v40, 0.0 }
 0x13a   :  { %v235_v46 = vmax.f32 %v225_v42, 0.0 }
 0x13b   :  { %v233_v48 = vmax.f32 %v217_v44, 0.0 }
 0x13c   :  { %v239_v49 = vpack.c.bf16 %v235_v46, %v234_v45 }
 0x13d   :  { %v238_v50 = vpack.c.bf16 %v233_v48, %v232_v47 }
 0x13f   :  { %777 = vmatprep.mubr.bf16.mxu1 %v238_v50 }
 0x140   :  { %778 = vmatmul.mubr.bf16.gmra.mrb[4].mxu1 %v239_v49 }
 0x20b   :  { %v775_v54 = vpop.f32.mrb[0].mxu1 }
 0x20c   :  { %v354_v55 = vadd.f32 %v775_v54, %v644_v53  ;;  %v345_v56 = vpop.f32.mrb[1].mxu1 }
 0x20d   :  { %v346_v57 = vadd.f32 %v644_v53, %v345_v56  ;;  %v776_v58 = vpop.f32.mrb[2].mxu1 }
 0x20e   :  { %v357_v59 = vadd.f32 %v776_v58, %v644_v53  ;;  %v348_v60 = vpop.f32.mrb[3].mxu1  ;;  %v378_v62 = vmax.f32 %v354_v55, 0.0 }
 0x20f   :  { %v349_v61 = vadd.f32 %v644_v53, %v348_v60  ;;  %v376_v0 = vmax.f32 %v346_v57, 0.0 }
 0x210   :  { %v379_v63 = vmax.f32 %v357_v59, 0.0 }
 0x211   :  { %v377_v1 = vmax.f32 %v349_v61, 0.0 }
 0x212   :  { %v385_v2 = vpack.c.bf16 %v379_v63, %v378_v62 }
 0x213   :  { %v384_v3 = vpack.c.bf16 %v377_v1, %v376_v0  ;;  %v779_v4 = vpop.f32.mrb[4].mxu1 }
 0x214   :  { %v370_v5 = vadd.f32 %v779_v4, %v644_v53  ;;  %v361_v6 = vpop.f32.mrb[5].mxu1 }
 0x215   :  { %v362_v7 = vadd.f32 %v644_v53, %v361_v6  ;;  %v780_v8 = vpop.f32.mrb[6].mxu1  ;;  %797 = vmatprep.mubr.bf16.mxu0 %v384_v3 }
 0x216   :  { %v373_v9 = vadd.f32 %v780_v8, %v644_v53  ;;  %v364_v10 = vpop.f32.mrb[7].mxu1  ;;  %798 = vmatmul.mubr.bf16.vlgmr.msra.gmra.mrb[8].mxu0 %v385_v2  ;;  %v382_v12 = vmax.f32 %v370_v5, 0.0 }
 0x217   :  { %v365_v11 = vadd.f32 %v644_v53, %v364_v10  ;;  %v380_v14 = vmax.f32 %v362_v7, 0.0 }
 0x218   :  { %v383_v13 = vmax.f32 %v373_v9, 0.0 }
 0x219   :  { %v381_v15 = vmax.f32 %v365_v11, 0.0 }
 0x21a   :  { %v387_v16 = vpack.c.bf16 %v383_v13, %v382_v12 }
 0x21b   :  { %v386_v17 = vpack.c.bf16 %v381_v15, %v380_v14 }
 0x21d   :  { %801 = vmatprep.mubr.bf16.mxu0 %v386_v17 }
 0x21e   :  { %802 = vmatmul.mubr.bf16.gmra.mrb[12].mxu0 %v387_v16 }
 0x2e9   :  { %v799_v19 = vpop.f32.mrb[8].mxu0 }
 0x2ea   :  { %v502_v20 = vadd.f32 %v799_v19, %v653_v18  ;;  %v493_v21 = vpop.f32.mrb[9].mxu0 }
 0x2eb   :  { %v494_v22 = vadd.f32 %v653_v18, %v493_v21  ;;  %v800_v23 = vpop.f32.mrb[10].mxu0 }
 0x2ec   :  { %v664_v24 = vmul.f32 -1.442695, %v502_v20  ;;  %v505_v25 = vadd.f32 %v800_v23, %v653_v18  ;;  %v496_v26 = vpop.f32.mrb[11].mxu0 }
 0x2ed   :  { %v662_v27 = vmul.f32 -1.442695, %v494_v22  ;;  %v497_v28 = vadd.f32 %v653_v18, %v496_v26 }
 0x2ee   :  { %836 = vpow2.f32 %v664_v24  ;;  %v665_v29 = vmul.f32 -1.442695, %v505_v25 }
 0x2ef   :  { %838 = vpow2.f32 %v662_v27  ;;  %v663_v30 = vmul.f32 -1.442695, %v497_v28 }
 0x2f0   :  { %840 = vpow2.f32 %v665_v29 }
 0x2f1   :  { %842 = vpow2.f32 %v663_v30  ;;  %v803_v31 = vpop.f32.mrb[12].mxu0 }
 0x2f2   :  { %v518_v32 = vadd.f32 %v803_v31, %v653_v18  ;;  %v509_v33 = vpop.f32.mrb[13].mxu0 }
 0x2f3   :  { %v510_v34 = vadd.f32 %v653_v18, %v509_v33  ;;  %v804_v35 = vpop.f32.mrb[14].mxu0 }
 0x2f4   :  { %v668_v36 = vmul.f32 -1.442695, %v518_v32  ;;  %v521_v37 = vadd.f32 %v804_v35, %v653_v18  ;;  %v512_v38 = vpop.f32.mrb[15].mxu0 }
 0x2f5   :  { %v666_v39 = vmul.f32 -1.442695, %v510_v34  ;;  %v513_v40 = vadd.f32 %v653_v18, %v512_v38 }
 0x2f6   :  { %844 = vpow2.f32 %v668_v36  ;;  %v669_v41 = vmul.f32 -1.442695, %v521_v37 }
 0x2f7   :  { %846 = vpow2.f32 %v666_v39  ;;  %v667_v42 = vmul.f32 -1.442695, %v513_v40 }
 0x2f8   :  { %v837_v43 = vpop.eup %836  ;;  %848 = vpow2.f32 %v669_v41 }
 0x2f9   :  { %v839_v44 = vpop.eup %838  ;;  %v550_v45 = vadd.f32 1.0, %v837_v43  ;;  %850 = vpow2.f32 %v667_v42 }
 0x2fa   :  { %v841_v46 = vpop.eup %840  ;;  %v548_v47 = vadd.f32 1.0, %v839_v44 }
 0x2fb   :  { %v843_v48 = vpop.eup %842  ;;  %852 = vrcp.f32 %v550_v45  ;;  %v551_v49 = vadd.f32 1.0, %v841_v46 }
 0x2fc   :  { %854 = vrcp.f32 %v548_v47  ;;  %v549_v50 = vadd.f32 1.0, %v843_v48 }
 0x2fd   :  { %856 = vrcp.f32 %v551_v49 }
 0x2fe   :  { %858 = vrcp.f32 %v549_v50 }
 0x300   :  { %v845_v51 = vpop.eup %844 }
 0x301   :  { %v847_v52 = vpop.eup %846  ;;  %v554_v53 = vadd.f32 1.0, %v845_v51 }
 0x302   :  { %v849_v54 = vpop.eup %848  ;;  %v552_v55 = vadd.f32 1.0, %v847_v52 }
 0x303   :  { %v851_v56 = vpop.eup %850  ;;  %860 = vrcp.f32 %v554_v53  ;;  %v555_v57 = vadd.f32 1.0, %v849_v54 }
 0x304   :  { %862 = vrcp.f32 %v552_v55  ;;  %v553_v58 = vadd.f32 1.0, %v851_v56 }
 0x305   :  { %v853_v59 = vpop.eup %852  ;;  %864 = vrcp.f32 %v555_v57 }
 0x306   :  { %v855_v60 = vpop.eup %854  ;;  %866 = vrcp.f32 %v553_v58 }
 0x307   :  { %v857_v61 = vpop.eup %856 }
 0x308   :  { %v859_v62 = vpop.eup %858  ;;  %v694_v63 = vpack.c.bf16 %v857_v61, %v853_v59 }
 0x309   :  { %v689_v0 = vpack.c.bf16 %v859_v62, %v855_v60 }
 0x30a   :  { %706 = vst [vmem:[#allocation10 + $0x8] sm:$0xff] %v694_v63  }
 0x30b   :  { %690 = vst [vmem:[#allocation10] sm:$0xff] %v689_v0  }
 0x30d   :  { %v861_v1 = vpop.eup %860 }
 0x30e   :  { %v863_v2 = vpop.eup %862 }
 0x30f   :  { %v865_v3 = vpop.eup %864 }
 0x310   :  { %v867_v4 = vpop.eup %866  ;;  %v704_v5 = vpack.c.bf16 %v865_v3, %v861_v1 }
 0x311   :  { %v699_v6 = vpack.c.bf16 %v867_v4, %v863_v2 }
 0x312   :  { %708 = vst [vmem:[#allocation10 + $0x18] sm:$0xff] %v704_v5  }
 0x313   :  { %707 = vst [vmem:[#allocation10 + $0x10] sm:$0xff] %v699_v6  }
 0x314   :  { %967 = shalt.err (!%p964_p8)
}
 0x315   :  { %s968_s11 = scalar_lea.hbm %s1142_s7, 512 }
 0x316   :  { %p969_p9 = scmp.ne.s32.totalorder %s1142_s7, %s968_s11  ;;  %p972_p10 = scmp.lt.u32.totalorder %s968_s11, %s1142_s7 }
 0x318   :  { %p974_p11 = pnand %p972_p10, %p969_p9 }
 0x31a   :  { %977 = shalt.err (!%p974_p11)
}
 0x31b   :  { %623 = dma.vmem_to_hbm [thread:$0]  %s618_s30, 512, %s1142_s7, [#allocation4], %s988_s13, %s988_s13, %s989_s14  }
 0x31c   :  { %984 = dma.done.wait [#allocation4], 512  }
 0x31d   :  { %985 = vsyncadd [#allocation4], 4294966784 }
 0x31e   :  { %627 = vsyncpa [#allocation3], 1 }
 0x31f   :  { %628 = vsyncpa [#allocation6], 1 }
 0x320   :  { %629 = vsyncpa [#allocation9], 1 }
 0x321   :  { %630 = vsyncpa [#allocation4], 1 }

</bundles_post_ra>
